<compile_context>
chip_gen: v7x
topology: tpu7x:2x2x1
jax: 0.10.0
libtpu: 0.0.40
codegen_flags: <defaults>
</compile_context>

<pallas_src>
import math

import jax
import jax.numpy as jnp
from jax.experimental import pallas as pl
from jax.experimental.pallas import tpu as pltpu


def _edge_kernel(x_ref, rowmask_ref, o_ref):
    """x_ref: (TR, W) native dtype, TR = TB*H rows (TB images stacked).

    out[r, :] = relu(x[r, :] - x[r+1, :]) * rowmask[r, :]
    where rowmask zeroes the last row of every image (the ZeroPad2d row).
    The wrap-around row produced by the roll only lands on masked rows.
    """
    x = x_ref[...].astype(jnp.float32)                  # upcast in-kernel (VPU)
    tr = x.shape[0]
    below = pltpu.roll(x, shift=tr - 1, axis=0)         # row r -> row (r+1) mod TR (XLU)
    edge = jnp.maximum(x - below, 0.0)                  # conv [[1],[-1]] + ReLU (VPU)
    o_ref[...] = (edge * rowmask_ref[...]).astype(o_ref.dtype)


def net_edge_vertical2(mask, *, target_block_bytes=2 << 20, min_grid_steps=4):
    """Pallas NetEdgeVertical2.forward.  mask: (B, 1, H, W) NCHW -> edge (B, 1, H, W)."""
    B, C, H, W = mask.shape
    n_img = B * C
    itemsize = jnp.dtype(mask.dtype).itemsize

    # ---- choose images-per-block (TB): ~1-2 MiB blocks, but keep >= a few grid
    # ---- steps so v7x's two TensorCores both get work. -------------------------
    img_bytes = H * W * itemsize
    tb = max(1, target_block_bytes // max(1, img_bytes))
    tb = min(tb, max(1, n_img // min_grid_steps))
    tb = max(1, min(tb, n_img))
    # (8,128) rule: block sublane count TB*H must be a multiple of 8.
    align = 8 // math.gcd(H, 8)
    tb = ((tb + align - 1) // align) * align
    TR = tb * H
    grid = (pl.cdiv(n_img, tb),)

    # Flatten images onto the sublane axis; keep the native dtype (no astype pass).
    x = mask.reshape(n_img * H, W)

    # Resident 0/1 mask zeroing the last row of each image inside a block.
    row_keep = ((jnp.arange(TR) % H) != (H - 1)).astype(jnp.float32)
    row_mask = jnp.broadcast_to(row_keep[:, None], (TR, W))

    out = pl.pallas_call(
        _edge_kernel,
        out_shape=jax.ShapeDtypeStruct((n_img * H, W), mask.dtype),
        grid=grid,
        in_specs=[
            pl.BlockSpec((TR, W), lambda b: (b, 0)),   # TB images per step
            pl.BlockSpec((TR, W), lambda b: (0, 0)),   # constant block -> stays resident
        ],
        out_specs=pl.BlockSpec((TR, W), lambda b: (b, 0)),
        compiler_params=pltpu.CompilerParams(dimension_semantics=("parallel",)),
    )(x, row_mask)

    return out.reshape(B, C, H, W)


# ------------------------- pure-JAX reference ------------------------------ #
def _ref_forward(mask):
    m = mask.astype(jnp.float32)
    edge = m[:, :, :-1, :] - m[:, :, 1:, :]                  # conv (2,1), weight [1,-1]
    edge = jnp.pad(edge, ((0, 0), (0, 0), (0, 1), (0, 0)))   # ZeroPad2d((0,0,0,1))
    return jnp.maximum(edge, 0.0).astype(mask.dtype)         # ReLU


# --------------------------------- main ------------------------------------ #
if __name__ == "__main__":
    # Module fixes C=1 (Conv2d(1,1,...)); W=128 keeps the lane axis dense.
    B, C, H, W = 8, 1, 16, 128

    key = jax.random.PRNGKey(0)
    mask = jax.random.uniform(key, (B, C, H, W), jnp.float32)

    edge = net_edge_vertical2(mask)
    jax.block_until_ready(edge)

    edge_ref = _ref_forward(mask)
    assert edge.shape == (B, C, H, W)
    assert edge.dtype == mask.dtype
    assert jnp.allclose(edge, edge_ref, atol=1e-6, rtol=1e-6)

    print("KERNEL_OK")
</pallas_src>

<mosaic_0001>
module attributes {stable_mosaic.version = 11 : i64} {
  func.func @_edge_kernel(%arg0: i32, %arg1: memref<32x128xf32, #tpu.memory_space<vmem>>, %arg2: memref<32x128xf32, #tpu.memory_space<vmem>>, %arg3: memref<32x128xf32, #tpu.memory_space<vmem>>) attributes {dimension_semantics = [#tpu.dimension_semantics<parallel>], iteration_bounds = array<i64: 4>, scalar_prefetch = 0 : i64, scratch_operands = 0 : i64, tpu.core_type = #tpu.core_type<tc>, window_params = [{transform_indices = @transform_0, window_bounds = array<i64: 32, 128>}, {pipeline_mode = #tpu.pipeline_mode<synchronous>, transform_indices = @transform_1, window_bounds = array<i64: 32, 128>}, {transform_indices = @transform_2, window_bounds = array<i64: 32, 128>}]} {
    %c0 = arith.constant 0 : index
    %c0_0 = arith.constant 0 : index
    %0 = vector.load %arg1[%c0, %c0_0] : memref<32x128xf32, #tpu.memory_space<vmem>>, vector<32x128xf32>
    %c31_i32 = arith.constant 31 : i32
    %1 = tpu.dynamic_rotate %0 by %c31_i32 dim 0 : vector<32x128xf32>, i32 -> vector<32x128xf32>
    %2 = arith.subf %0, %1 : vector<32x128xf32>
    %cst = arith.constant 0.000000e+00 : f32
    %3 = vector.broadcast %cst : f32 to vector<32x128xf32>
    %4 = arith.maximumf %2, %3 : vector<32x128xf32>
    %c0_1 = arith.constant 0 : index
    %c0_2 = arith.constant 0 : index
    %5 = vector.load %arg2[%c0_1, %c0_2] : memref<32x128xf32, #tpu.memory_space<vmem>>, vector<32x128xf32>
    %6 = arith.mulf %4, %5 : vector<32x128xf32>
    %c0_3 = arith.constant 0 : index
    %c0_4 = arith.constant 0 : index
    %7 = vector.load %arg3[%c0_3, %c0_4] : memref<32x128xf32, #tpu.memory_space<vmem>>, vector<32x128xf32>
    tpu.vector_store %arg3[%c0_3, %c0_4], %6 {strides = array<i32>} : memref<32x128xf32, #tpu.memory_space<vmem>>, vector<32x128xf32>,
    return
  }
  func.func @transform_0(%arg0: i32) -> (i32, i32) {
    %c0_i32 = arith.constant 0 : i32
    %c0_i32_0 = arith.constant 0 : i32
    return %arg0, %c0_i32 : i32, i32
  }
  func.func @transform_1(%arg0: i32) -> (i32, i32) {
    %c0_i32 = arith.constant 0 : i32
    %c0_i32_0 = arith.constant 0 : i32
    %c0_i32_1 = arith.constant 0 : i32
    return %c0_i32, %c0_i32_0 : i32, i32
  }
  func.func @transform_2(%arg0: i32) -> (i32, i32) {
    %c0_i32 = arith.constant 0 : i32
    %c0_i32_0 = arith.constant 0 : i32
    return %arg0, %c0_i32 : i32, i32
  }
}

</mosaic_0001>

<bundles_post_ra>
// kernel: tpu_custom_call.1
= control target key start
LH: loop header
LB: loop body
LE: loop exit
PB: predicated region body
PF: predicated region fallthrough
CT: control target
= control target key end

     0   :  { %7 = vsyncpa [#allocation3], 0  ;;  %s740_s0 = inlined_call_operand.hbm [shape: f32[128,128], index: 0, kind: input, shape index: {}]   ;;  %s741_s1 = inlined_call_operand.hbm [shape: f32[32,128], index: 1, kind: input, shape index: {}]   ;;  %s742_s2 = inlined_call_operand.hbm [shape: f32[128,128], index: 2, kind: output, shape index: {}]  }
   0x1   :  { %9 = vsyncpa [#allocation3 + $0x1], 0 }
   0x2   :  { %10 = vsyncpa [#allocation6], 0 }
   0x3   :  { %11 = vsyncpa [#allocation4], 0 }
   0x4   :  { %13 = vsyncpa [#allocation4 + $0x1], 0  ;;  %s542_s9 = smov 0   ;;  %s544_s10 = smov 0  }
   0x5   :  { %s546_s11 = smov 0   ;;  %s548_s12 = smov 0  }
   0x6 LB: > { %s563_s13 = sadd.s32 4294967295, %s518_s12   ;;  %s311_s14 = sadd.s32 4294967294, %s518_s12   ;;  %s518_s12 = sphi %s548_s12, %s761_s12   ;;  %s514_s11 = sphi %s546_s11, %s760_s11   ;;  %s510_s10 = sphi %s544_s10, %s759_s10   ;;  %s506_s9 = sphi %s542_s9, %s758_s9  }
   0x7   : > { %p39_p0 = scmp.ne.s32.totalorder %s510_s10, %s506_s9  ;;  %p743_p1 = scmp.eq.s32.totalorder %s563_s13, 0 }
   0x8   : > { %p90_p3 = scmp.eq.s32.totalorder %s311_s14, 3  ;;  %p312_p5 = scmp.ge.s32.totalorder %s518_s12, 1 }
   0x9   : > { %p572_p4 = por %p743_p1, %p39_p0  ;;  %p97_p7 = scmp.lt.s32.totalorder %s518_s12, 5 }
   0xa   : > { %p577_p6 = por %p90_p3, %p39_p0  ;;  %s520_s18 = smov [#allocation5]  }
   0xb   : > { %s746_s15 = scalar_select %p572_p4, 1, 0 }
   0xc   : > { %s747_s16 = scalar_select %p577_p6, 1, 0 }
   0xd   : > { %p582_p8 = pnand %p312_p5, %p97_p7  ;;  %s109_s19 = sshll.u32 %s520_s18, 4  ;;  %s110_s19 = int_to_ptr.vmem [resolvable:$true] %s109_s19 }
   0xe   : > { %s595_s21 = sadd.s32 1, %s518_s12   ;;  %s26_s22 = sadd.s32 1, %s514_s11 }
   0xf   : > { %s748_s17 = scalar_select %p582_p8, 1, 0 }
  0x10   : > { %p337_p9 = pneg %p582_p8  ;;  %s23_s23 = ssub.s32 %s518_s12, %s595_s21 }
  0x11   : > { %s390_s26 = scalar_lea.hbm %s741_s1, 512 }
  0x12   : > { %p590_p10 = pnand %p337_p9, %p743_p1  ;;  %p391_p11 = scmp.ne.s32.totalorder %s741_s1, %s390_s26 }
  0x13   : > { %p397_p3 = scmp.lt.u32.totalorder %s390_s26, %s741_s1 }
  0x14   : > { %p392_p12 = pneg %p590_p10 }
  0x16   : > { %p393_p13 = pnand %p392_p12, %p391_p11 }
  0x18   : > { %p394_p0 = pneg %p393_p13 }
  0x1a   : > { %p399_p5 = pnand %p397_p3, %p394_p0 }
  0x1c   : > { %402 = shalt.err (!%p399_p5)
}
  0x1d   : > { %s403_s3 = scalar_lea.vmem %s110_s19, 512  ;;  %p411_p2 = scmp.lt.s32.totalorder %s110_s19, %s110_s19 }
  0x1e   : > { %p404_p7 = scmp.ne.s32.totalorder %s110_s19, %s403_s3  ;;  %p412_p6 = scmp.lt.s32.totalorder %s403_s3, %s403_s3 }
  0x20   : > { %p406_p9 = pnand %p404_p7, %p392_p12  ;;  %p413_p4 = por %p412_p6, %p411_p2 }
  0x22   : > { %p407_p1 = pneg %p406_p9 }
  0x24   : > { %p414_p8 = pnand %p413_p4, %p407_p1 }
  0x26   : > { %417 = shalt.err (!%p414_p8)
}
  0x27   : > { %s521_s4 = smov 128   ;;  %s522_s5 = smov 8  }
  0x28   : > { %340 = dma.hbm_to_vmem [thread:$0]  (!%p590_p10), %s741_s1, 512, %s110_s19, [#allocation6], %s521_s4, %s521_s4, %s522_s5  }
  0x29   : > { %p24_p1 = scmp.eq.s32.totalorder %s23_s23, 0  ;;  %p33_p2 = scmp.ne.s32.totalorder %s514_s11, %s510_s10 }
  0x2a   : > { %p34_p4 = scmp.eq.s32.totalorder %s518_s12, 0  ;;  %p350_p6 = scmp.lt.s32.totalorder %s518_s12, 4 }
  0x2b   : > { %s624_s8 = scalar_select %p24_p1, %s514_s11, %s26_s22  }
  0x2c   : > { %p35_p8 = por %p34_p4, %p33_p2  ;;  %p750_p11 = scmp.eq.s32.totalorder %s563_s13, 3 }
  0x2d   : > { %s123_s18 = sand.u32 1, %s514_s11   ;;  %s327_s20 = sshll.u32 %s518_s12, 9 }
  0x2e   : > { %p628_p12 = por %p750_p11, %p33_p2  ;;  %s315_s24 = sshll.u32 %s123_s18, 5 }
  0x2f   : > { %s637_s27 = scalar_lea.hbm %s740_s0, %s327_s20  ;;  %s127_s19 = scalar_lea.vmem [#allocation2], %s315_s24 }
  0x30   : > { %s134_s22 = sshll.u32 %s127_s19, 4  ;;  %p639_p10 = pnand %p350_p6, %p35_p8  ;;  %s643_s22 = int_to_ptr.vmem [resolvable:$true] %s134_s22 }
  0x31   : > { %s645_s28 = scalar_lea.sflag [#allocation3], %s123_s18  ;;  %s418_s29 = scalar_lea.hbm %s637_s27, 512 }
  0x32   : > { %p419_p13 = scmp.ne.s32.totalorder %s637_s27, %s418_s29  ;;  %p420_p0 = pneg %p639_p10 }
  0x33   : > { %s423_s6 = scalar_lea.hbm %s740_s0, 2048  ;;  %p424_p7 = scmp.lt.u32.totalorder %s637_s27, %s740_s0 }
  0x34   : > { %p421_p3 = pnand %p420_p0, %p419_p13  ;;  %p425_p9 = scmp.lt.u32.totalorder %s423_s6, %s418_s29 }
  0x35   : > { %p427_p2 = scmp.lt.u32.totalorder %s418_s29, %s637_s27 }
  0x36   : > { %p422_p5 = pneg %p421_p3  ;;  %p426_p1 = por %p425_p9, %p424_p7 }
  0x38   : > { %p428_p4 = por %p427_p2, %p426_p1 }
  0x3a   : > { %p429_p6 = pnand %p428_p4, %p422_p5 }
  0x3c   : > { %432 = shalt.err (!%p429_p6)
}
  0x3d   : > { %s433_s18 = scalar_lea.vmem %s643_s22, 512  ;;  %s523_s24 = smov [#allocation2]  }
  0x3e   : > { %p434_p8 = scmp.ne.s32.totalorder %s643_s22, %s433_s18  ;;  %s438_s25 = sshll.u32 %s523_s24, 4  ;;  %s439_s25 = int_to_ptr.vmem [resolvable:$false] %s438_s25 }
  0x3f   : > { %s440_s26 = scalar_lea.vmem %s439_s25, 1024  ;;  %p441_p3 = scmp.lt.s32.totalorder %s643_s22, %s439_s25 }
  0x40   : > { %p436_p11 = pnand %p434_p8, %p420_p0  ;;  %p442_p7 = scmp.lt.s32.totalorder %s440_s26, %s433_s18 }
  0x42   : > { %p437_p13 = pneg %p436_p11  ;;  %p443_p9 = por %p442_p7, %p441_p3 }
  0x44   : > { %p444_p1 = pnand %p443_p9, %p437_p13 }
  0x46   : > { %447 = shalt.err (!%p444_p1)
}
  0x47   : > { %344 = dma.hbm_to_vmem [thread:$0]  (!%p639_p10), %s637_s27, 512, %s643_s22, %s645_s28, %s521_s4, %s521_s4, %s522_s5  }
  0x48   : > { %p753_p0 = scmp.ne.s32.totalorder %s748_s17, 0 }
  0x49   : > { %s679_s19 = sand.u32 (!%p753_p0), 1, %s510_s10   ;;  %p754_p5 = scmp.ne.s32.totalorder (!%p753_p0), %s746_s15, 0 }
  0x4a   : > { %146 = sbr.rel (%p753_p0) target bundleno = 113 (0x71), region = 28  ;;  %s319_s29 = sshll.u32 (!%p753_p0), %s679_s19, 5 }
  0x4b   : > { %s149_s30 = scalar_lea.sflag (!%p753_p0), [#allocation3], %s679_s19  ;;  %s152_s3 = scalar_lea.vmem (!%p753_p0), [#allocation2], %s319_s29 }
  0x51   : > { %493 = dma.done.wait (%p754_p5), %s149_s30, 512  }
  0x52   : > { %495 = vsyncadd (%p754_p5), %s149_s30, 4294966784  ;;  %p755_p2 = scmp.eq.s32.totalorder %s563_s13, 0 }
  0x54   : > { %497 = dma.done.wait (%p755_p2), [#allocation6], 512   ;;  %p756_p10 = pmov %p755_p2 }
  0x55   : > { %v187_v0 = vlaneseq  ;;  %v179_v2 = vld [vmem:[%s152_s3] sm:$0xff]  ;;  %v180_v3 = vld [vmem:[%s152_s3 + $0x8] sm:$0xff]  ;;  %v181_v6 = vld [vmem:[%s152_s3 + $0x10] sm:$0xff]  ;;  %s176_s15 = scalar_lea.vmem [#allocation7], %s319_s29  ;;  %s328_s4 = sshll.u32 %s563_s13, 9 }
  0x56   : > { %499 = vsyncadd (%p756_p10), [#allocation6], 4294966784  ;;  %v183_v4 = vrot.slane %v179_v2, 1  ;;  %v184_v5 = vrot.slane %v180_v3, 1  ;;  %v182_v7 = vld [vmem:[%s152_s3 + $0x18] sm:$0xff]  ;;  %v185_v8 = vrot.slane %v181_v6, 1  ;;  %s697_s22 = scalar_lea.hbm %s742_s2, %s328_s4 }
  0x57   : > { %v188_v1 = vshrl.u32 %v187_v0, 7  ;;  %v186_v9 = vrot.slane %v182_v7, 1  ;;  %v202_v15 = vld [vmem:[#allocation5] sm:$0xff]  ;;  %s228_s17 = sshll.u32 %s176_s15, 4  ;;  %v203_v20 = vld [vmem:[#allocation5 + $0x8] sm:$0xff]  ;;  %v204_v21 = vld [vmem:[#allocation5 + $0x10] sm:$0xff]  ;;  %s692_s17 = int_to_ptr.vmem [resolvable:$true] %s228_s17 }
  0x58   : > { %v205_v22 = vld [vmem:[#allocation5 + $0x18] sm:$0xff]  ;;  %s215_s13 = scalar_lea.sflag [#allocation4], %s679_s19  ;;  %s448_s23 = scalar_lea.vmem %s692_s17, 512 }
  0x59   : > { %vm189_vm0 = vcmp.lt.s32.totalorder %v188_v1, 7  ;;  %p449_p4 = scmp.ne.s32.totalorder %s692_s17, %s448_s23  ;;  %s524_s28 = smov [#allocation7]  }
  0x5a   : > { %v192_v10 = vsel %vm189_vm0, %v183_v4, %v184_v5  ;;  %v191_v12 = vsel %vm189_vm0, %v184_v5, %v185_v8  ;;  %v190_v13 = vsel %vm189_vm0, %v185_v8, %v186_v9  ;;  %v193_v14 = vsel %vm189_vm0, %v186_v9, %v183_v4  ;;  %s452_s6 = sshll.u32 %s524_s28, 4  ;;  %s453_s6 = int_to_ptr.vmem [resolvable:$false] %s452_s6 }
  0x5b   : > { %v194_v11 = vsub.f32 %v179_v2, %v192_v10  ;;  %v195_v16 = vsub.f32 %v180_v3, %v191_v12  ;;  %v196_v17 = vsub.f32 %v181_v6, %v190_v13  ;;  %v197_v18 = vsub.f32 %v182_v7, %v193_v14  ;;  %p450_p6 = pnand %p449_p4, %p628_p12  ;;  %s454_s7 = scalar_lea.vmem %s453_s6, 1024 }
  0x5c   : > { %p455_p11 = scmp.lt.s32.totalorder %s692_s17, %s453_s6  ;;  %p456_p13 = scmp.lt.s32.totalorder %s454_s7, %s448_s23 }
  0x5d   : > { %v198_v19 = vmax.f32 %v194_v11, 0.0  ;;  %v199_v23 = vmax.f32 %v195_v16, 0.0  ;;  %v200_v24 = vmax.f32 %v196_v17, 0.0  ;;  %v201_v25 = vmax.f32 %v197_v18, 0.0  ;;  %p451_p8 = pneg %p450_p6 }
  0x5e   : > { %p457_p3 = por %p456_p13, %p455_p11 }
  0x5f   : > { %v206_v26 = vmul.f32 %v202_v15, %v198_v19  ;;  %v207_v27 = vmul.f32 %v203_v20, %v199_v23  ;;  %v208_v28 = vmul.f32 %v204_v21, %v200_v24  ;;  %v209_v29 = vmul.f32 %v205_v22, %v201_v25 }
  0x60   : > { %p458_p7 = pnand %p457_p3, %p451_p8 }
  0x61   : > { %210 = vst [vmem:[%s176_s15] sm:$0xff] %v206_v26  ;;  %211 = vst [vmem:[%s176_s15 + $0x8] sm:$0xff] %v207_v27 }
  0x62   : > { %212 = vst [vmem:[%s176_s15 + $0x10] sm:$0xff] %v208_v28  ;;  %213 = vst [vmem:[%s176_s15 + $0x18] sm:$0xff] %v209_v29 }
  0x63   : > { %461 = shalt.err (!%p458_p7)
}
  0x64   : > { %s462_s20 = scalar_lea.hbm %s697_s22, 512  ;;  %s466_s25 = scalar_lea.hbm %s742_s2, 2048 }
  0x65   : > { %p463_p9 = scmp.ne.s32.totalorder %s697_s22, %s462_s20  ;;  %p467_p5 = scmp.lt.u32.totalorder %s697_s22, %s742_s2 }
  0x66   : > { %p468_p2 = scmp.lt.u32.totalorder %s466_s25, %s462_s20  ;;  %p470_p4 = scmp.lt.u32.totalorder %s462_s20, %s697_s22 }
  0x67   : > { %p464_p1 = pnand %p463_p9, %p628_p12 }
  0x68   : > { %p469_p10 = por %p468_p2, %p467_p5 }
  0x69   : > { %p465_p0 = pneg %p464_p1 }
  0x6a   : > { %p471_p6 = por %p470_p4, %p469_p10 }
  0x6c   : > { %p472_p8 = pnand %p471_p6, %p465_p0 }
  0x6e   : > { %475 = shalt.err (!%p472_p8)
}
  0x6f   : > { %s525_s30 = smov 128   ;;  %s526_s3 = smov 8  }
  0x70   : > { %335 = dma.vmem_to_hbm [thread:$0]  (%p628_p12), %s692_s17, 512, %s697_s22, %s215_s13, %s525_s30, %s525_s30, %s526_s3  }
  0x71 PF: > { %p352_p11 = scmp.ge.s32.totalorder %s518_s12, 2  ;;  %s243_s15 = sand.u32 1, %s506_s9  }
  0x72   : > { %p757_p13 = scmp.ne.s32.totalorder %s747_s16, 0  ;;  %s244_s4 = scalar_lea.sflag [#allocation4], %s243_s15 }
  0x74   : > { %p346_p3 = pnand %p352_p11, %p757_p13 }
  0x76   : > { %501 = dma.done.wait (!%p346_p3), %s244_s4, 512  }
  0x77   : > { %503 = vsyncadd (!%p346_p3), %s244_s4, 4294966784  ;;  %p16_p7 = scmp.ge.s32.totalorder %s595_s21, 6   ;;  %s758_s9 = smov %s510_s10 }
  0x78   : > { %s759_s10 = smov %s514_s11  ;;  %s760_s11 = smov %s624_s8 }
  0x79   : > { %s761_s12 = smov %s595_s21  ;;  %18 = sbr.rel (!%p16_p7) target bundleno = 6 (0x6), region = 77 }
  0x80   :  { %249 = vsyncpa [#allocation3], 1 }
  0x81   :  { %251 = vsyncpa [#allocation3 + $0x1], 1 }
  0x82   :  { %252 = vsyncpa [#allocation6], 1 }
  0x83   :  { %253 = vsyncpa [#allocation4], 1 }
  0x84   :  { %255 = vsyncpa [#allocation4 + $0x1], 1 }

</bundles_post_ra>
